<compile_context>
chip_gen: v7x
topology: tpu7x:2x2x1
jax: 0.10.0
libtpu: 0.0.40
codegen_flags: <defaults>
</compile_context>

<pallas_src>
import functools

import jax
import jax.numpy as jnp
from jax.experimental import pallas as pl
from jax.experimental.pallas import tpu as pltpu


def _round_up(x, m):
    return ((x + m - 1) // m) * m


def mlp_kernel(x_ref,
               w1_ref, b1_ref,
               w2_ref, b2_ref,
               w3_ref, b3_ref,
               w4_ref, b4_ref,
               w5_ref, b5_ref,
               o_ref):
    """One TILE_M x input_dim tile of x -> TILE_M x out_dim tile of output."""

    def dense(h_bf16, w_ref, b_ref):
        # bf16 operands, f32 accumulation on the MXU, f32 bias add.
        return (jnp.dot(h_bf16, w_ref[...], preferred_element_type=jnp.float32)
                + b_ref[...])

    def relu_bf16(h_f32):
        # ReLU in f32, then narrow to bf16 for the next MXU pass.
        return jnp.maximum(h_f32, 0.0).astype(jnp.bfloat16)

    # Cast x to bf16 in-kernel (x arrives f32 straight from HBM).
    h = x_ref[...].astype(jnp.bfloat16)              # bf16 [TILE_M, in]
    h = relu_bf16(dense(h, w1_ref, b1_ref))          # fc1 + ReLU
    h = relu_bf16(dense(h, w2_ref, b2_ref))          # fc2 + ReLU
    h = relu_bf16(dense(h, w3_ref, b3_ref))          # fc3 + ReLU
    h = relu_bf16(dense(h, w4_ref, b4_ref))          # fc4 + ReLU
    o_ref[...] = dense(h, w5_ref, b5_ref).astype(o_ref.dtype)   # fc5 (no act)


def _choose_tile_m(batch, tile_m):
    """Pick an M tile: multiple of 16 (bf16 sublane packing), capped at the
    (rounded) batch, split in two for large single-tile batches so v7x's two
    TensorCores both get a grid step."""
    tm_cap = max(16, _round_up(tile_m, 16))
    bm = _round_up(batch, 16)
    if bm <= tm_cap:
        if bm >= 512:
            # Big enough that a second grid step is essentially free; gives
            # v7x megacore two steps to shard across.
            return _round_up(pl.cdiv(bm, 2), 16)
        return bm
    return tm_cap


def mlp_forward(x, params, *, tile_m=2048):
    """x: [batch, input_dim] f32; params: list of (W [in, out] f32, b [1, out] f32)."""
    batch, input_dim = x.shape
    out_dim = params[-1][0].shape[-1]

    tm = _choose_tile_m(batch, tile_m)
    grid = (pl.cdiv(batch, tm),)   # partial final block handled by Pallas masking

    # bf16 weight operands for the MXU; biases stay f32 (bias/ReLU in f32).
    flat_args = []
    flat_specs = []
    for w, b in params:
        flat_args.append(w.astype(jnp.bfloat16))
        flat_specs.append(pl.BlockSpec(w.shape, lambda i: (0, 0)))   # resident in VMEM
        flat_args.append(b.astype(jnp.float32))
        flat_specs.append(pl.BlockSpec(b.shape, lambda i: (0, 0)))   # resident in VMEM

    # Working set per step (lane-padded, double-buffered) is a few MiB even at
    # tm=4096; 32 MiB is safe on every generation (incl. v5e's smaller default
    # scoped VMEM and v7x's 64 MiB physical per-TC VMEM).
    vmem_limit = 32 * 1024 * 1024

    out = pl.pallas_call(
        mlp_kernel,
        out_shape=jax.ShapeDtypeStruct((batch, out_dim), jnp.float32),
        grid=grid,
        in_specs=[pl.BlockSpec((tm, input_dim), lambda i: (i, 0))] + flat_specs,
        out_specs=pl.BlockSpec((tm, out_dim), lambda i: (i, 0)),
        compiler_params=pltpu.CompilerParams(
            dimension_semantics=("parallel",),   # v7x: shard batch grid over 2 TCs
            vmem_limit_bytes=vmem_limit),
    )(x, *flat_args)

    return out


def init_params(key, input_dim, output_dim):
    """Deterministic init mimicking PyTorch nn.Linear default U(-1/sqrt(fan_in), ...)."""
    dims = [input_dim, 64, 48, 24, 12, output_dim]
    params = []
    for i in range(len(dims) - 1):
        fan_in, fan_out = dims[i], dims[i + 1]
        key, kw, kb = jax.random.split(key, 3)
        bound = 1.0 / (fan_in ** 0.5)
        w = jax.random.uniform(kw, (fan_in, fan_out), jnp.float32, -bound, bound)
        b = jax.random.uniform(kb, (1, fan_out), jnp.float32, -bound, bound)
        params.append((w, b))
    return params


def reference_forward_bf16(x, params):
    """Reference that mirrors the kernel's mixed precision (bf16 operands, f32 accum)."""
    h = x.astype(jnp.bfloat16)
    for i, (w, b) in enumerate(params):
        h = jnp.dot(h, w.astype(jnp.bfloat16),
                    preferred_element_type=jnp.float32) + b
        if i < len(params) - 1:
            h = jnp.maximum(h, 0.0).astype(jnp.bfloat16)
    return h


def reference_forward_f32(x, params):
    h = x
    for i, (w, b) in enumerate(params):
        h = h @ w + b
        if i < len(params) - 1:
            h = jnp.maximum(h, 0.0)
    return h


if __name__ == "__main__":
    key = jax.random.PRNGKey(0)
    input_dim, output_dim, batch = 32, 10, 37   # ragged batch exercises partial-block masking

    kp, kx = jax.random.split(key)
    params = init_params(kp, input_dim, output_dim)
    x = jax.random.normal(kx, (batch, input_dim), jnp.float32)

    fwd = jax.jit(functools.partial(mlp_forward, tile_m=2048))
    out = jax.block_until_ready(fwd(x, params))

    assert out.shape == (batch, output_dim)

    # Tight check against a reference with matching bf16/f32 mixed precision.
    ref_bf16 = reference_forward_bf16(x, params)
    assert jnp.allclose(out, ref_bf16, atol=1e-2, rtol=1e-2), (
        jnp.max(jnp.abs(out - ref_bf16)))

    # Looser sanity check against the pure-f32 PyTorch-equivalent math.
    ref_f32 = reference_forward_f32(x, params)
    assert jnp.allclose(out, ref_f32, atol=5e-2, rtol=5e-2), (
        jnp.max(jnp.abs(out - ref_f32)))

    print("KERNEL_OK")
</pallas_src>

<mosaic_0001>
module attributes {stable_mosaic.version = 11 : i64} {
  func.func @mlp_kernel(%arg0: i32, %arg1: memref<48x32xf32, #tpu.memory_space<vmem>>, %arg2: memref<32x64xbf16, #tpu.memory_space<vmem>>, %arg3: memref<1x64xf32, #tpu.memory_space<vmem>>, %arg4: memref<64x48xbf16, #tpu.memory_space<vmem>>, %arg5: memref<1x48xf32, #tpu.memory_space<vmem>>, %arg6: memref<48x24xbf16, #tpu.memory_space<vmem>>, %arg7: memref<1x24xf32, #tpu.memory_space<vmem>>, %arg8: memref<24x12xbf16, #tpu.memory_space<vmem>>, %arg9: memref<1x12xf32, #tpu.memory_space<vmem>>, %arg10: memref<12x10xbf16, #tpu.memory_space<vmem>>, %arg11: memref<1x10xf32, #tpu.memory_space<vmem>>, %arg12: memref<48x10xf32, #tpu.memory_space<vmem>>) attributes {dimension_semantics = [#tpu.dimension_semantics<parallel>], iteration_bounds = array<i64: 1>, scalar_prefetch = 0 : i64, scratch_operands = 0 : i64, tpu.core_type = #tpu.core_type<tc>, window_params = [{transform_indices = @transform_0, window_bounds = array<i64: 48, 32>}, {pipeline_mode = #tpu.pipeline_mode<synchronous>, transform_indices = @transform_1, window_bounds = array<i64: 32, 64>}, {pipeline_mode = #tpu.pipeline_mode<synchronous>, transform_indices = @transform_2, window_bounds = array<i64: 1, 64>}, {pipeline_mode = #tpu.pipeline_mode<synchronous>, transform_indices = @transform_3, window_bounds = array<i64: 64, 48>}, {pipeline_mode = #tpu.pipeline_mode<synchronous>, transform_indices = @transform_4, window_bounds = array<i64: 1, 48>}, {pipeline_mode = #tpu.pipeline_mode<synchronous>, transform_indices = @transform_5, window_bounds = array<i64: 48, 24>}, {pipeline_mode = #tpu.pipeline_mode<synchronous>, transform_indices = @transform_6, window_bounds = array<i64: 1, 24>}, {pipeline_mode = #tpu.pipeline_mode<synchronous>, transform_indices = @transform_7, window_bounds = array<i64: 24, 12>}, {pipeline_mode = #tpu.pipeline_mode<synchronous>, transform_indices = @transform_8, window_bounds = array<i64: 1, 12>}, {pipeline_mode = #tpu.pipeline_mode<synchronous>, transform_indices = @transform_9, window_bounds = array<i64: 12, 10>}, {pipeline_mode = #tpu.pipeline_mode<synchronous>, transform_indices = @transform_10, window_bounds = array<i64: 1, 10>}, {transform_indices = @transform_11, window_bounds = array<i64: 48, 10>}]} {
    %c0 = arith.constant 0 : index
    %c0_0 = arith.constant 0 : index
    %0 = vector.load %arg1[%c0, %c0_0] : memref<48x32xf32, #tpu.memory_space<vmem>>, vector<48x32xf32>
    %1 = arith.truncf %0 : vector<48x32xf32> to vector<48x32xbf16>
    %c0_1 = arith.constant 0 : index
    %c0_2 = arith.constant 0 : index
    %2 = vector.load %arg2[%c0_1, %c0_2] : memref<32x64xbf16, #tpu.memory_space<vmem>>, vector<32x64xbf16>
    %cst = arith.constant dense<0.000000e+00> : vector<48x64xf32>
    %3 = tpu.matmul %1, %2, %cst {dimension_numbers = #tpu.dot_dimension_numbers<[1], [0], [0], [1], [0, 0, 1, 1], [], []>} : vector<48x32xbf16>, vector<32x64xbf16>, vector<48x64xf32> -> vector<48x64xf32>
    %c0_3 = arith.constant 0 : index
    %c0_4 = arith.constant 0 : index
    %4 = vector.load %arg3[%c0_3, %c0_4] : memref<1x64xf32, #tpu.memory_space<vmem>>, vector<1x64xf32>
    %5 = vector.broadcast %4 : vector<1x64xf32> to vector<48x64xf32>
    %6 = arith.addf %3, %5 : vector<48x64xf32>
    %cst_5 = arith.constant 0.000000e+00 : f32
    %7 = vector.broadcast %cst_5 : f32 to vector<48x64xf32>
    %8 = arith.maximumf %6, %7 : vector<48x64xf32>
    %9 = arith.truncf %8 : vector<48x64xf32> to vector<48x64xbf16>
    %c0_6 = arith.constant 0 : index
    %c0_7 = arith.constant 0 : index
    %10 = vector.load %arg4[%c0_6, %c0_7] : memref<64x48xbf16, #tpu.memory_space<vmem>>, vector<64x48xbf16>
    %cst_8 = arith.constant dense<0.000000e+00> : vector<48x48xf32>
    %11 = tpu.matmul %9, %10, %cst_8 {dimension_numbers = #tpu.dot_dimension_numbers<[1], [0], [0], [1], [0, 0, 1, 1], [], []>} : vector<48x64xbf16>, vector<64x48xbf16>, vector<48x48xf32> -> vector<48x48xf32>
    %c0_9 = arith.constant 0 : index
    %c0_10 = arith.constant 0 : index
    %12 = vector.load %arg5[%c0_9, %c0_10] : memref<1x48xf32, #tpu.memory_space<vmem>>, vector<1x48xf32>
    %13 = vector.broadcast %12 : vector<1x48xf32> to vector<48x48xf32>
    %14 = arith.addf %11, %13 : vector<48x48xf32>
    %cst_11 = arith.constant 0.000000e+00 : f32
    %15 = vector.broadcast %cst_11 : f32 to vector<48x48xf32>
    %16 = arith.maximumf %14, %15 : vector<48x48xf32>
    %17 = arith.truncf %16 : vector<48x48xf32> to vector<48x48xbf16>
    %c0_12 = arith.constant 0 : index
    %c0_13 = arith.constant 0 : index
    %18 = vector.load %arg6[%c0_12, %c0_13] : memref<48x24xbf16, #tpu.memory_space<vmem>>, vector<48x24xbf16>
    %cst_14 = arith.constant dense<0.000000e+00> : vector<48x24xf32>
    %19 = tpu.matmul %17, %18, %cst_14 {dimension_numbers = #tpu.dot_dimension_numbers<[1], [0], [0], [1], [0, 0, 1, 1], [], []>} : vector<48x48xbf16>, vector<48x24xbf16>, vector<48x24xf32> -> vector<48x24xf32>
    %c0_15 = arith.constant 0 : index
    %c0_16 = arith.constant 0 : index
    %20 = vector.load %arg7[%c0_15, %c0_16] : memref<1x24xf32, #tpu.memory_space<vmem>>, vector<1x24xf32>
    %21 = vector.broadcast %20 : vector<1x24xf32> to vector<48x24xf32>
    %22 = arith.addf %19, %21 : vector<48x24xf32>
    %cst_17 = arith.constant 0.000000e+00 : f32
    %23 = vector.broadcast %cst_17 : f32 to vector<48x24xf32>
    %24 = arith.maximumf %22, %23 : vector<48x24xf32>
    %25 = arith.truncf %24 : vector<48x24xf32> to vector<48x24xbf16>
    %c0_18 = arith.constant 0 : index
    %c0_19 = arith.constant 0 : index
    %26 = vector.load %arg8[%c0_18, %c0_19] : memref<24x12xbf16, #tpu.memory_space<vmem>>, vector<24x12xbf16>
    %cst_20 = arith.constant dense<0.000000e+00> : vector<48x12xf32>
    %27 = tpu.matmul %25, %26, %cst_20 {dimension_numbers = #tpu.dot_dimension_numbers<[1], [0], [0], [1], [0, 0, 1, 1], [], []>} : vector<48x24xbf16>, vector<24x12xbf16>, vector<48x12xf32> -> vector<48x12xf32>
    %c0_21 = arith.constant 0 : index
    %c0_22 = arith.constant 0 : index
    %28 = vector.load %arg9[%c0_21, %c0_22] : memref<1x12xf32, #tpu.memory_space<vmem>>, vector<1x12xf32>
    %29 = vector.broadcast %28 : vector<1x12xf32> to vector<48x12xf32>
    %30 = arith.addf %27, %29 : vector<48x12xf32>
    %cst_23 = arith.constant 0.000000e+00 : f32
    %31 = vector.broadcast %cst_23 : f32 to vector<48x12xf32>
    %32 = arith.maximumf %30, %31 : vector<48x12xf32>
    %33 = arith.truncf %32 : vector<48x12xf32> to vector<48x12xbf16>
    %c0_24 = arith.constant 0 : index
    %c0_25 = arith.constant 0 : index
    %34 = vector.load %arg10[%c0_24, %c0_25] : memref<12x10xbf16, #tpu.memory_space<vmem>>, vector<12x10xbf16>
    %cst_26 = arith.constant dense<0.000000e+00> : vector<48x10xf32>
    %35 = tpu.matmul %33, %34, %cst_26 {dimension_numbers = #tpu.dot_dimension_numbers<[1], [0], [0], [1], [0, 0, 1, 1], [], []>} : vector<48x12xbf16>, vector<12x10xbf16>, vector<48x10xf32> -> vector<48x10xf32>
    %c0_27 = arith.constant 0 : index
    %c0_28 = arith.constant 0 : index
    %36 = vector.load %arg11[%c0_27, %c0_28] : memref<1x10xf32, #tpu.memory_space<vmem>>, vector<1x10xf32>
    %37 = vector.broadcast %36 : vector<1x10xf32> to vector<48x10xf32>
    %38 = arith.addf %35, %37 : vector<48x10xf32>
    %c0_29 = arith.constant 0 : index
    %c0_30 = arith.constant 0 : index
    %39 = vector.load %arg12[%c0_29, %c0_30] : memref<48x10xf32, #tpu.memory_space<vmem>>, vector<48x10xf32>
    tpu.vector_store %arg12[%c0_29, %c0_30], %38 {strides = array<i32>} : memref<48x10xf32, #tpu.memory_space<vmem>>, vector<48x10xf32>,
    return
  }
  func.func @transform_0(%arg0: i32) -> (i32, i32) {
    %c0_i32 = arith.constant 0 : i32
    %c0_i32_0 = arith.constant 0 : i32
    return %arg0, %c0_i32 : i32, i32
  }
  func.func @transform_1(%arg0: i32) -> (i32, i32) {
    %c0_i32 = arith.constant 0 : i32
    %c0_i32_0 = arith.constant 0 : i32
    %c0_i32_1 = arith.constant 0 : i32
    return %c0_i32, %c0_i32_0 : i32, i32
  }
  func.func @transform_2(%arg0: i32) -> (i32, i32) {
    %c0_i32 = arith.constant 0 : i32
    %c0_i32_0 = arith.constant 0 : i32
    %c0_i32_1 = arith.constant 0 : i32
    return %c0_i32, %c0_i32_0 : i32, i32
  }
  func.func @transform_3(%arg0: i32) -> (i32, i32) {
    %c0_i32 = arith.constant 0 : i32
    %c0_i32_0 = arith.constant 0 : i32
    %c0_i32_1 = arith.constant 0 : i32
    return %c0_i32, %c0_i32_0 : i32, i32
  }
  func.func @transform_4(%arg0: i32) -> (i32, i32) {
    %c0_i32 = arith.constant 0 : i32
    %c0_i32_0 = arith.constant 0 : i32
    %c0_i32_1 = arith.constant 0 : i32
    return %c0_i32, %c0_i32_0 : i32, i32
  }
  func.func @transform_5(%arg0: i32) -> (i32, i32) {
    %c0_i32 = arith.constant 0 : i32
    %c0_i32_0 = arith.constant 0 : i32
    %c0_i32_1 = arith.constant 0 : i32
    return %c0_i32, %c0_i32_0 : i32, i32
  }
  func.func @transform_6(%arg0: i32) -> (i32, i32) {
    %c0_i32 = arith.constant 0 : i32
    %c0_i32_0 = arith.constant 0 : i32
    %c0_i32_1 = arith.constant 0 : i32
    return %c0_i32, %c0_i32_0 : i32, i32
  }
  func.func @transform_7(%arg0: i32) -> (i32, i32) {
    %c0_i32 = arith.constant 0 : i32
    %c0_i32_0 = arith.constant 0 : i32
    %c0_i32_1 = arith.constant 0 : i32
    return %c0_i32, %c0_i32_0 : i32, i32
  }
  func.func @transform_8(%arg0: i32) -> (i32, i32) {
    %c0_i32 = arith.constant 0 : i32
    %c0_i32_0 = arith.constant 0 : i32
    %c0_i32_1 = arith.constant 0 : i32
    return %c0_i32, %c0_i32_0 : i32, i32
  }
  func.func @transform_9(%arg0: i32) -> (i32, i32) {
    %c0_i32 = arith.constant 0 : i32
    %c0_i32_0 = arith.constant 0 : i32
    %c0_i32_1 = arith.constant 0 : i32
    return %c0_i32, %c0_i32_0 : i32, i32
  }
  func.func @transform_10(%arg0: i32) -> (i32, i32) {
    %c0_i32 = arith.constant 0 : i32
    %c0_i32_0 = arith.constant 0 : i32
    %c0_i32_1 = arith.constant 0 : i32
    return %c0_i32, %c0_i32_0 : i32, i32
  }
  func.func @transform_11(%arg0: i32) -> (i32, i32) {
    %c0_i32 = arith.constant 0 : i32
    %c0_i32_0 = arith.constant 0 : i32
    return %arg0, %c0_i32 : i32, i32
  }
}

</mosaic_0001>

<bundles_post_ra>
// kernel: mlp_forward.1
= control target key start
LH: loop header
LB: loop body
LE: loop exit
PB: predicated region body
PF: predicated region fallthrough
CT: control target
= control target key end

     0   :  { %v777_v1 = vmov 0.0   ;;  %vm778_vm0 = vmmov 0   ;;  %vm71_vm1 = vcmask 261120   ;;  %vm186_vm2 = vcmask 523264   ;;  %s987_s0 = inlined_call_operand.vmem [shape: f32[37,32], index: 0, kind: input, shape index: {}]   ;;  %s988_s1 = inlined_call_operand.vmem [shape: bf16[32,64], index: 1, kind: input, shape index: {}]   ;;  %s989_s2 = inlined_call_operand.vmem [shape: f32[1,64], index: 2, kind: input, shape index: {}]   ;;  %s990_s3 = inlined_call_operand.vmem [shape: bf16[64,48], index: 3, kind: input, shape index: {}]   ;;  %s991_s4 = inlined_call_operand.vmem [shape: f32[1,48], index: 4, kind: input, shape index: {}]   ;;  %s992_s5 = inlined_call_operand.vmem [shape: bf16[48,24], index: 5, kind: input, shape index: {}]   ;;  %s993_s6 = inlined_call_operand.vmem [shape: f32[1,24], index: 6, kind: input, shape index: {}]   ;;  %s994_s7 = inlined_call_operand.vmem [shape: bf16[24,12], index: 7, kind: input, shape index: {}]   ;;  %s995_s8 = inlined_call_operand.vmem [shape: f32[1,12], index: 8, kind: input, shape index: {}]   ;;  %s996_s9 = inlined_call_operand.vmem [shape: bf16[12,10], index: 9, kind: input, shape index: {}]   ;;  %s997_s10 = inlined_call_operand.vmem [shape: f32[1,10], index: 10, kind: input, shape index: {}]   ;;  %s998_s11 = inlined_call_operand.vmem [shape: f32[37,10], index: 11, kind: output, shape index: {}]  }
   0x1   :  { %v765_v0 = vld [vmem:[%s988_s1] sm:$0xff]   ;;  %675 = vmatprep.subr.bf16.mxu0 %v777_v1  ;;  %759 = vmatprep.subr.bf16.mxu1 %v777_v1  ;;  %v766_v2 = vld [vmem:[%s988_s1 + $0x8] sm:$0xff]   ;;  %v41_v10 = vld [vmem:[%s987_s0 + $0x10] sm:$0xff]  ;;  %vm398_vm3 = vcmask 1043456   ;;  %vm293_vm4 = vcmask 392192   ;;  %vm492_vm5 = vcmask 1045504  }
   0x2   :  { %676 = vmatpush3.bf16.msra.mxu0 %v765_v0  ;;  %679 = vmatprep.mubr.msk.bf16.mxu0 %vm778_vm0, %v777_v1  ;;  %v39_v3 = vld [vmem:[%s987_s0] sm:$0xff]  ;;  %v40_v4 = vld [vmem:[%s987_s0 + $0x8] sm:$0xff]  ;;  %v42_v11 = vld [vmem:[%s987_s0 + $0x18] sm:$0xff]  ;;  %vm388_vm6 = vcmask 195584   ;;  %vm482_vm7 = vcmask 97280   ;;  %vm553_vm8 = vcmask 80896  }
   0x3   :  { %677 = vmatprep.subr.bf16.mxu0 %v777_v1  ;;  %761 = vmatpush3.bf16.msra.mxu1 %v765_v0  ;;  %v43_v5 = vld [vmem:[%s987_s0 + $0x20] sm:$0xff]  ;;  %v44_v6 = vld [vmem:[%s987_s0 + $0x28] sm:$0xff]  ;;  %v45_v7 = vpack.c.bf16 %v40_v4, %v39_v3  ;;  %v46_v13 = vpack.c.bf16 %v42_v11, %v41_v10  ;;  %v769_v14 = vld [vmem:[%s990_s3 + $0x10] sm:$0xff]  }
   0x4   :  { %760 = vmatprep.subr.bf16.mxu1 %v777_v1  ;;  %687 = vmatprep.mubr.msk.bf16.mxu1 %vm778_vm0, %v777_v1  ;;  %v47_v8 = vpack.c.bf16 %v44_v6, %v43_v5  ;;  %v767_v9 = vld [vmem:[%s990_s3] sm:$0xff]   ;;  %v768_v12 = vld [vmem:[%s990_s3 + $0x8] sm:$0xff]   ;;  %v770_v15 = vld [vmem:[%s990_s3 + $0x18] sm:$0xff]  }
   0x5   :  { %v771_v16 = vld [vmem:[%s992_s5] sm:$0xff]   ;;  %v772_v17 = vld [vmem:[%s992_s5 + $0x8] sm:$0xff]   ;;  %v773_v46 = vld [vmem:[%s992_s5 + $0x10] sm:$0xff]  }
   0x6   :  { %678 = vmatpush3.bf16.msra.mxu0 %v766_v2  ;;  %v616_v18 = vld [vmem:[%s989_s2] ss:$0 sm:$0xff]  ;;  %v775_v48 = vld [vmem:[%s994_s7 + $0x8] ss:$0 sps:$4 sm:$0xff]  }
   0x7   :  { %762 = vmatpush3.bf16.msra.mxu1 %v766_v2  ;;  %711 = vmatprep.subr.bf16.mxu0 %v777_v1  ;;  %v774_v47 = vld [vmem:[%s994_s7] sm:$0xff]   ;;  %v400_v49 = vsel %vm398_vm3, %v775_v48, 0 }
   0x8   :  { %691 = vmatprep.subr.bf16.mxu1 %v777_v1  ;;  %v622_v50 = vld [vmem:[%s991_s4] ss:$0 sm:$0xff] }
   0x9   :  { %680 = vmatmul.mubr.msk.bf16.vlgmr.msra.gmra.mrb[0].mxu0 %vm71_vm1, %v45_v7 }
   0xa   :  { %683 = vmatprep.mubr.msk.bf16.mxu0 %vm778_vm0, %v777_v1  ;;  %688 = vmatmul.mubr.msk.bf16.vlgmr.msra.gmra.mrb[0].mxu1 %vm71_vm1, %v47_v8 }
   0xb   :  { %692 = vmatpush3.bf16.msra.mxu1 %v767_v9  ;;  %699 = vmatprep.mubr.msk.bf16.mxu1 %vm778_vm0, %v777_v1 }
   0xc   :  { %693 = vmatprep.subr.bf16.mxu1 %v777_v1  ;;  %712 = vmatpush3.bf16.msra.mxu0 %v771_v16 }
   0xd   :  { %713 = vmatprep.subr.bf16.mxu0 %v777_v1 }
   0xf   :  { %694 = vmatpush3.bf16.msra.mxu1 %v768_v12 }
  0x10   :  { %695 = vmatprep.subr.bf16.mxu1 %v777_v1  ;;  %714 = vmatpush3.bf16.msra.mxu0 %v772_v17  ;;  %v630_v17 = vld [vmem:[%s993_s6] ss:$0 sm:$0xff] }
  0x11   :  { %684 = vmatmul.mubr.msk.bf16.gmra.mrb[4].mxu0 %vm71_vm1, %v46_v13  ;;  %715 = vmatprep.subr.bf16.mxu0 %v777_v1 }
  0x12   :  { %717 = vmatprep.mubr.msk.bf16.mxu0 %vm778_vm0, %v777_v1 }
  0x13   :  { %696 = vmatpush3.bf16.msra.mxu1 %v769_v14 }
  0x14   :  { %697 = vmatprep.subr.bf16.mxu1 %v777_v1  ;;  %716 = vmatpush3.bf16.msra.mxu0 %v773_v46 }
  0x15   :  { %745 = vmatprep.subr.bf16.mxu0 %v777_v1 }
  0x17   :  { %698 = vmatpush3.bf16.msra.mxu1 %v770_v15  ;;  %v776_v15 = vld [vmem:[%s996_s9] sm:$0x3f]  }
  0x18   :  { %729 = vmatprep.subr.bf16.mxu1 %v777_v1  ;;  %v494_v16 = vsel %vm492_vm5, %v776_v15, 0 }
  0xdc   :  { %v115_v19 = vpop.f32.mrb[0].mxu0 }
  0xdd   :  { %v116_v20 = vadd.f32 %v616_v18, %v115_v19  ;;  %v681_v21 = vpop.f32.mrb[1].mxu0  ;;  %v131_v22 = vpop.f32.mrb[0].mxu1 }
  0xde   :  { %v118_v23 = vpop.f32.mrb[2].mxu0  ;;  %v132_v24 = vadd.f32 %v616_v18, %v131_v22  ;;  %v689_v25 = vpop.f32.mrb[1].mxu1 }
  0xdf   :  { %v119_v26 = vadd.f32 %v616_v18, %v118_v23  ;;  %v682_v27 = vpop.f32.mrb[3].mxu0  ;;  %v134_v28 = vpop.f32.mrb[2].mxu1  ;;  %v138_v32 = vmax.f32 %v116_v20, 0.0 }
  0xe0   :  { %v142_v29 = vmax.f32 %v132_v24, 0.0  ;;  %v135_v30 = vadd.f32 %v616_v18, %v134_v28  ;;  %v690_v31 = vpop.f32.mrb[3].mxu1 }
  0xe1   :  { %v139_v33 = vmax.f32 %v119_v26, 0.0 }
  0xe2   :  { %v143_v34 = vmax.f32 %v135_v30, 0.0 }
  0xe3   :  { %v144_v35 = vpack.c.bf16 %v139_v33, %v138_v32 }
  0xe4   :  { %v123_v36 = vpop.f32.mrb[4].mxu0  ;;  %v146_v37 = vpack.c.bf16 %v143_v34, %v142_v29 }
  0xe5   :  { %v124_v38 = vadd.f32 %v616_v18, %v123_v36  ;;  %v685_v39 = vpop.f32.mrb[5].mxu0  ;;  %700 = vmatmul.mubr.msk.bf16.vlgmr.msra.gmra.mrb[4].mxu1 %vm186_vm2, %v144_v35 }
  0xe6   :  { %v126_v40 = vpop.f32.mrb[6].mxu0  ;;  %703 = vmatprep.mubr.msk.bf16.mxu1 %vm778_vm0, %v777_v1  ;;  %730 = vmatpush3.bf16.msra.mxu1 %v774_v47 }
  0xe7   :  { %v127_v41 = vadd.f32 %v616_v18, %v126_v40  ;;  %v686_v42 = vpop.f32.mrb[7].mxu0  ;;  %v140_v43 = vmax.f32 %v124_v38, 0.0  ;;  %731 = vmatprep.subr.bf16.mxu1 %v777_v1 }
  0xe9   :  { %v141_v44 = vmax.f32 %v127_v41, 0.0 }
  0xea   :  { %732 = vmatpush3.bf16.msra.mxu1 %v400_v49 }
  0xeb   :  { %v145_v45 = vpack.c.bf16 %v141_v44, %v140_v43 }
  0xed   :  { %704 = vmatmul.mubr.msk.bf16.gmra.mrb[8].mxu1 %vm186_vm2, %v145_v45  ;;  %v637_v45 = vld [vmem:[%s995_s8] ss:$0 sm:$0xff] }
  0xee   :  { %707 = vmatprep.mubr.msk.bf16.mxu1 %vm778_vm0, %v777_v1 }
  0xf5   :  { %708 = vmatmul.mubr.msk.bf16.gmra.mrb[12].mxu1 %vm186_vm2, %v146_v37 }
  0xf6   :  { %733 = vmatprep.mubr.msk.bf16.mxu1 %vm778_vm0, %v777_v1 }
 0x1b8   :  { %v230_v51 = vpop.f32.mrb[4].mxu1 }
 0x1b9   :  { %v231_v52 = vadd.f32 %v622_v50, %v230_v51  ;;  %v701_v53 = vpop.f32.mrb[5].mxu1 }
 0x1ba   :  { %v233_v54 = vpop.f32.mrb[6].mxu1 }
 0x1bb   :  { %v234_v55 = vadd.f32 %v622_v50, %v233_v54  ;;  %v702_v56 = vpop.f32.mrb[7].mxu1  ;;  %v253_v57 = vmax.f32 %v231_v52, 0.0 }
 0x1bd   :  { %v254_v58 = vmax.f32 %v234_v55, 0.0 }
 0x1bf   :  { %v259_v59 = vpack.c.bf16 %v254_v58, %v253_v57 }
 0x1c0   :  { %v238_v60 = vpop.f32.mrb[8].mxu1 }
 0x1c1   :  { %v239_v61 = vadd.f32 %v622_v50, %v238_v60  ;;  %v705_v62 = vpop.f32.mrb[9].mxu1  ;;  %718 = vmatmul.mubr.msk.bf16.vlgmr.msra.gmra.mrb[8].mxu0 %vm293_vm4, %v259_v59 }
 0x1c2   :  { %v241_v63 = vpop.f32.mrb[10].mxu1  ;;  %721 = vmatprep.mubr.msk.bf16.mxu0 %vm778_vm0, %v777_v1  ;;  %746 = vmatpush3.bf16.msra.mxu0 %v494_v16 }
 0x1c3   :  { %v242_v0 = vadd.f32 %v622_v50, %v241_v63  ;;  %v706_v2 = vpop.f32.mrb[11].mxu1  ;;  %v255_v3 = vmax.f32 %v239_v61, 0.0 }
 0x1c5   :  { %v256_v4 = vmax.f32 %v242_v0, 0.0 }
 0x1c7   :  { %v260_v5 = vpack.c.bf16 %v256_v4, %v255_v3 }
 0x1c8   :  { %v246_v6 = vpop.f32.mrb[12].mxu1 }
 0x1c9   :  { %v247_v7 = vadd.f32 %v622_v50, %v246_v6  ;;  %v709_v8 = vpop.f32.mrb[13].mxu1  ;;  %722 = vmatmul.mubr.msk.bf16.gmra.mrb[12].mxu0 %vm293_vm4, %v260_v5 }
 0x1ca   :  { %v249_v9 = vpop.f32.mrb[14].mxu1  ;;  %725 = vmatprep.mubr.msk.bf16.mxu0 %vm778_vm0, %v777_v1 }
 0x1cb   :  { %v250_v10 = vadd.f32 %v622_v50, %v249_v9  ;;  %v710_v11 = vpop.f32.mrb[15].mxu1  ;;  %v257_v12 = vmax.f32 %v247_v7, 0.0 }
 0x1cd   :  { %v258_v13 = vmax.f32 %v250_v10, 0.0  ;;  %v643_v10 = vld [vmem:[%s997_s10] ss:$0 sm:$0xff] }
 0x1cf   :  { %v261_v14 = vpack.c.bf16 %v258_v13, %v257_v12 }
 0x1d1   :  { %726 = vmatmul.mubr.msk.bf16.gmra.mrb[16].mxu0 %vm293_vm4, %v261_v14 }
 0x1d2   :  { %747 = vmatprep.mubr.msk.bf16.mxu0 %vm778_vm0, %v777_v1 }
 0x294   :  { %v337_v18 = vpop.f32.mrb[8].mxu0 }
 0x295   :  { %v338_v19 = vadd.f32 %v630_v17, %v337_v18  ;;  %v719_v20 = vpop.f32.mrb[9].mxu0 }
 0x296   :  { %v340_v21 = vpop.f32.mrb[10].mxu0 }
 0x297   :  { %v341_v22 = vadd.f32 %v630_v17, %v340_v21  ;;  %v720_v23 = vpop.f32.mrb[11].mxu0  ;;  %v360_v24 = vmax.f32 %v338_v19, 0.0 }
 0x299   :  { %v361_v25 = vmax.f32 %v341_v22, 0.0 }
 0x29b   :  { %v366_v26 = vpack.c.bf16 %v361_v25, %v360_v24 }
 0x29c   :  { %v345_v27 = vpop.f32.mrb[12].mxu0 }
 0x29d   :  { %v346_v28 = vadd.f32 %v630_v17, %v345_v27  ;;  %v723_v29 = vpop.f32.mrb[13].mxu0  ;;  %734 = vmatmul.mubr.msk.bf16.vlgmr.msra.gmra.mrb[16].mxu1 %vm388_vm6, %v366_v26 }
 0x29e   :  { %v348_v30 = vpop.f32.mrb[14].mxu0  ;;  %737 = vmatprep.mubr.msk.bf16.mxu1 %vm778_vm0, %v777_v1 }
 0x29f   :  { %v349_v31 = vadd.f32 %v630_v17, %v348_v30  ;;  %v724_v32 = vpop.f32.mrb[15].mxu0  ;;  %v362_v33 = vmax.f32 %v346_v28, 0.0 }
 0x2a1   :  { %v363_v34 = vmax.f32 %v349_v31, 0.0 }
 0x2a3   :  { %v367_v35 = vpack.c.bf16 %v363_v34, %v362_v33 }
 0x2a4   :  { %v353_v36 = vpop.f32.mrb[16].mxu0 }
 0x2a5   :  { %v354_v37 = vadd.f32 %v630_v17, %v353_v36  ;;  %v727_v38 = vpop.f32.mrb[17].mxu0  ;;  %738 = vmatmul.mubr.msk.bf16.gmra.mrb[20].mxu1 %vm388_vm6, %v367_v35 }
 0x2a6   :  { %v356_v39 = vpop.f32.mrb[18].mxu0  ;;  %741 = vmatprep.mubr.msk.bf16.mxu1 %vm778_vm0, %v777_v1 }
 0x2a7   :  { %v357_v40 = vadd.f32 %v630_v17, %v356_v39  ;;  %v728_v41 = vpop.f32.mrb[19].mxu0  ;;  %v364_v42 = vmax.f32 %v354_v37, 0.0 }
 0x2a9   :  { %v365_v43 = vmax.f32 %v357_v40, 0.0 }
 0x2ab   :  { %v368_v44 = vpack.c.bf16 %v365_v43, %v364_v42 }
 0x2ad   :  { %742 = vmatmul.mubr.msk.bf16.gmra.mrb[24].mxu1 %vm388_vm6, %v368_v44 }
 0x370   :  { %v436_v46 = vpop.f32.mrb[16].mxu1 }
 0x371   :  { %v437_v47 = vadd.f32 %v637_v45, %v436_v46  ;;  %v735_v48 = vpop.f32.mrb[17].mxu1 }
 0x372   :  { %v439_v49 = vpop.f32.mrb[18].mxu1 }
 0x373   :  { %v440_v50 = vadd.f32 %v637_v45, %v439_v49  ;;  %v736_v51 = vpop.f32.mrb[19].mxu1  ;;  %v459_v52 = vmax.f32 %v437_v47, 0.0 }
 0x375   :  { %v460_v53 = vmax.f32 %v440_v50, 0.0 }
 0x377   :  { %v465_v54 = vpack.c.bf16 %v460_v53, %v459_v52 }
 0x378   :  { %v444_v55 = vpop.f32.mrb[20].mxu1 }
 0x379   :  { %v445_v56 = vadd.f32 %v637_v45, %v444_v55  ;;  %v739_v57 = vpop.f32.mrb[21].mxu1  ;;  %748 = vmatmul.mubr.msk.bf16.vlgmr.msra.gmra.mrb[20].mxu0 %vm482_vm7, %v465_v54 }
 0x37a   :  { %v447_v58 = vpop.f32.mrb[22].mxu1  ;;  %751 = vmatprep.mubr.msk.bf16.mxu0 %vm778_vm0, %v777_v1 }
 0x37b   :  { %v448_v59 = vadd.f32 %v637_v45, %v447_v58  ;;  %v740_v60 = vpop.f32.mrb[23].mxu1  ;;  %v461_v61 = vmax.f32 %v445_v56, 0.0 }
 0x37d   :  { %v462_v62 = vmax.f32 %v448_v59, 0.0 }
 0x37f   :  { %v466_v63 = vpack.c.bf16 %v462_v62, %v461_v61 }
 0x380   :  { %v452_v0 = vpop.f32.mrb[24].mxu1 }
 0x381   :  { %v453_v2 = vadd.f32 %v637_v45, %v452_v0  ;;  %v743_v3 = vpop.f32.mrb[25].mxu1  ;;  %752 = vmatmul.mubr.msk.bf16.gmra.mrb[24].mxu0 %vm482_vm7, %v466_v63 }
 0x382   :  { %v455_v4 = vpop.f32.mrb[26].mxu1  ;;  %755 = vmatprep.mubr.msk.bf16.mxu0 %vm778_vm0, %v777_v1 }
 0x383   :  { %v456_v5 = vadd.f32 %v637_v45, %v455_v4  ;;  %v744_v6 = vpop.f32.mrb[27].mxu1  ;;  %v463_v7 = vmax.f32 %v453_v2, 0.0 }
 0x385   :  { %v464_v8 = vmax.f32 %v456_v5, 0.0 }
 0x387   :  { %v467_v9 = vpack.c.bf16 %v464_v8, %v463_v7 }
 0x389   :  { %756 = vmatmul.mubr.msk.bf16.gmra.mrb[28].mxu0 %vm482_vm7, %v467_v9 }
 0x44c   :  { %v530_v11 = vpop.f32.mrb[20].mxu0 }
 0x44d   :  { %v531_v12 = vadd.f32 %v643_v10, %v530_v11  ;;  %v749_v13 = vpop.f32.mrb[21].mxu0 }
 0x44e   :  { %v533_v14 = vpop.f32.mrb[22].mxu0 }
 0x44f   :  { %554 = vst.msk [vmem:[#allocation2] sm:$0xff] %vm553_vm8, %v531_v12  ;;  %v534_v15 = vadd.f32 %v643_v10, %v533_v14  ;;  %v750_v1 = vpop.f32.mrb[23].mxu0 }
 0x451   :  { %555 = vst.msk [vmem:[#allocation2 + $0x8] sm:$0xff] %vm553_vm8, %v534_v15 }
 0x454   :  { %v538_v16 = vpop.f32.mrb[24].mxu0 }
 0x455   :  { %v539_v17 = vadd.f32 %v643_v10, %v538_v16  ;;  %v753_v18 = vpop.f32.mrb[25].mxu0 }
 0x456   :  { %v597_v19 = vld [vmem:[#allocation2] sm:$0xff]  ;;  %v541_v20 = vpop.f32.mrb[26].mxu0 }
 0x457   :  { %598 = vst [vmem:[%s998_s11] sm:$0xff] %v597_v19  ;;  %556 = vst.msk [vmem:[#allocation2 + $0x10] sm:$0xff] %vm553_vm8, %v539_v17  ;;  %v542_v21 = vadd.f32 %v643_v10, %v541_v20  ;;  %v754_v22 = vpop.f32.mrb[27].mxu0 }
 0x458   :  { %v599_v23 = vld [vmem:[#allocation2 + $0x8] sm:$0xff] }
 0x459   :  { %600 = vst [vmem:[%s998_s11 + $0x8] sm:$0xff] %v599_v23  ;;  %557 = vst.msk [vmem:[#allocation2 + $0x18] sm:$0xff] %vm553_vm8, %v542_v21 }
 0x45c   :  { %v546_v24 = vpop.f32.mrb[28].mxu0 }
 0x45d   :  { %v547_v25 = vadd.f32 %v643_v10, %v546_v24  ;;  %v757_v26 = vpop.f32.mrb[29].mxu0 }
 0x45e   :  { %v601_v27 = vld [vmem:[#allocation2 + $0x10] sm:$0xff]  ;;  %v549_v28 = vpop.f32.mrb[30].mxu0 }
 0x45f   :  { %602 = vst [vmem:[%s998_s11 + $0x10] sm:$0xff] %v601_v27  ;;  %558 = vst.msk [vmem:[#allocation2 + $0x20] sm:$0xff] %vm553_vm8, %v547_v25  ;;  %v758_v29 = vpop.f32.mrb[31].mxu0 }
 0x460   :  { %v603_v30 = vld [vmem:[#allocation2 + $0x18] sm:$0xff] }
 0x461   :  { %604 = vst [vmem:[%s998_s11 + $0x18] sm:$0xff] %v603_v30 }
 0x466   :  { %v605_v31 = vld [vmem:[#allocation2 + $0x20] sm:$0xff] }
 0x467   :  { %606 = vst [vmem:[%s998_s11 + $0x20] sm:$0xff] %v605_v31 }

</bundles_post_ra>
